<compile_context>
chip_gen: v6e
topology: v6e:2x2x1
jax: 0.10.0
libtpu: 0.0.40
codegen_flags: <defaults>
</compile_context>

<pallas_src>
import math

import jax
import jax.numpy as jnp
from jax.experimental import pallas as pl
from jax.experimental.pallas import tpu as pltpu


def _fd_loss_kernel(f1_ref, f2_ref, loss_ref):
    """One (TM, LANE) row-tile of the masked-MSE sum."""
    @pl.when(pl.program_id(0) == 0)
    def _():
        loss_ref[0, 0] = 0.0

    a = f1_ref[...].astype(jnp.float32)
    b = f2_ref[...].astype(jnp.float32)
    d = a - b
    mask = jnp.logical_or(a > 0.0, b > 0.0).astype(jnp.float32)
    val = jnp.abs(d * d * mask)          # abs is a no-op for non-negative vals
    loss_ref[0, 0] += jnp.sum(val)


def fd_loss(feat1, feat2, *, lane=512, max_rows_per_tile=512):
    """Feature Distillation Loss: sum(|(f1-f2)^2 * ((f1>0)|(f2>0))|)."""
    assert feat1.shape == feat2.shape, "feat1/feat2 must have the same shape"
    total = math.prod(feat1.shape)

    f1 = feat1.reshape(-1)
    f2 = feat2.reshape(-1)

    # Row-major lane-dense layout: (rows, lane), lane multiple of 128.
    rows = -(-total // lane)                       # cdiv
    tm = min(max_rows_per_tile, ((rows + 7) // 8) * 8)   # rows per tile, mult of 8
    padded_rows = -(-rows // tm) * tm
    padded_total = padded_rows * lane
    if padded_total != total:
        # Zero padding contributes exactly 0 to the loss (mask is False there).
        f1 = jnp.pad(f1, (0, padded_total - total))
        f2 = jnp.pad(f2, (0, padded_total - total))
    f1 = f1.reshape(padded_rows, lane)
    f2 = f2.reshape(padded_rows, lane)

    num_tiles = padded_rows // tm

    loss = pl.pallas_call(
        _fd_loss_kernel,
        out_shape=jax.ShapeDtypeStruct((1, 1), jnp.float32),
        grid=(num_tiles,),
        in_specs=[
            pl.BlockSpec((tm, lane), lambda i: (i, 0)),
            pl.BlockSpec((tm, lane), lambda i: (i, 0)),
        ],
        out_specs=pl.BlockSpec(memory_space=pltpu.SMEM),
        compiler_params=pltpu.CompilerParams(
            dimension_semantics=("arbitrary",)),
    )(f1, f2)
    return loss[0, 0]


def _reference_jax(feat1, feat2):
    f1 = feat1.astype(jnp.float32)
    f2 = feat2.astype(jnp.float32)
    mask = jnp.logical_or(f1 > 0, f2 > 0).astype(jnp.float32)
    return jnp.sum(jnp.abs((f1 - f2) ** 2 * mask))


if __name__ == "__main__":
    key = jax.random.PRNGKey(0)
    k1, k2 = jax.random.split(key)

    # Small feature maps: batch=2, channels=4, spatial 16x16.
    B, C, H, W = 2, 4, 16, 16
    feat1 = jax.random.normal(k1, (B, C, H, W), dtype=jnp.float32)
    feat2 = jax.random.normal(k2, (B, C, H, W), dtype=jnp.float32)

    loss = fd_loss(feat1, feat2)
    loss = jax.block_until_ready(loss)

    ref = _reference_jax(feat1, feat2)
    assert jnp.allclose(loss, ref, atol=1e-4, rtol=1e-5), (loss, ref)

    print("KERNEL_OK")
</pallas_src>

<mosaic_0001>
module attributes {stable_mosaic.version = 11 : i64} {
  func.func @_fd_loss_kernel(%arg0: i32, %arg1: memref<8x512xf32, #tpu.memory_space<vmem>>, %arg2: memref<8x512xf32, #tpu.memory_space<vmem>>, %arg3: memref<1x1xf32, #tpu.memory_space<smem>>) attributes {dimension_semantics = [#tpu.dimension_semantics<arbitrary>], iteration_bounds = array<i64: 1>, scalar_prefetch = 0 : i64, scratch_operands = 0 : i64, tpu.core_type = #tpu.core_type<tc>, window_params = [{transform_indices = @transform_0, window_bounds = array<i64: 8, 512>}, {transform_indices = @transform_1, window_bounds = array<i64: 8, 512>}, {transform_indices = @transform_2, window_bounds = array<i64: 1, 1>}]} {
    %c0_i32 = arith.constant 0 : i32
    %0 = arith.cmpi eq, %arg0, %c0_i32 : i32
    %1 = arith.extui %0 : i1 to i32
    %c0_i32_0 = arith.constant 0 : i32
    %2 = arith.cmpi ne, %1, %c0_i32_0 : i32
    scf.if %2 {
      %cst_10 = arith.constant 0.000000e+00 : f32
      %c0_11 = arith.constant 0 : index
      %c0_12 = arith.constant 0 : index
      %23 = memref.load %arg3[%c0_11, %c0_12] : memref<1x1xf32, #tpu.memory_space<smem>>
      memref.store %cst_10, %arg3[%c0_11, %c0_12] : memref<1x1xf32, #tpu.memory_space<smem>>
    } else {
    }
    %c0 = arith.constant 0 : index
    %c0_1 = arith.constant 0 : index
    %3 = vector.load %arg1[%c0, %c0_1] : memref<8x512xf32, #tpu.memory_space<vmem>>, vector<8x512xf32>
    %c0_2 = arith.constant 0 : index
    %c0_3 = arith.constant 0 : index
    %4 = vector.load %arg2[%c0_2, %c0_3] : memref<8x512xf32, #tpu.memory_space<vmem>>, vector<8x512xf32>
    %5 = arith.subf %3, %4 : vector<8x512xf32>
    %cst = arith.constant 0.000000e+00 : f32
    %6 = vector.broadcast %cst : f32 to vector<8x512xf32>
    %7 = arith.cmpf ogt, %3, %6 : vector<8x512xf32>
    %cst_4 = arith.constant 0.000000e+00 : f32
    %8 = vector.broadcast %cst_4 : f32 to vector<8x512xf32>
    %9 = arith.cmpf ogt, %4, %8 : vector<8x512xf32>
    %10 = arith.ori %7, %9 : vector<8x512xi1>
    %11 = arith.extui %10 : vector<8x512xi1> to vector<8x512xi32>
    %12 = arith.sitofp %11 : vector<8x512xi32> to vector<8x512xf32>
    %13 = arith.mulf %5, %5 : vector<8x512xf32>
    %14 = arith.mulf %13, %12 : vector<8x512xf32>
    %15 = math.absf %14 : vector<8x512xf32>
    %c0_5 = arith.constant 0 : index
    %c0_6 = arith.constant 0 : index
    %16 = memref.load %arg3[%c0_5, %c0_6] : memref<1x1xf32, #tpu.memory_space<smem>>
    %17 = vector.shape_cast %15 : vector<8x512xf32> to vector<1x8x512xf32>
    %cst_7 = arith.constant dense<0.000000e+00> : vector<1xf32>
    %18 = vector.multi_reduction <add>, %17, %cst_7 [1, 2] : vector<1x8x512xf32> to vector<1xf32>
    %19 = vector.shape_cast %18 : vector<1xf32> to vector<1x1x1xf32>
    %20 = vector.extract %19[0, 0, 0] : f32 from vector<1x1x1xf32>
    %21 = arith.addf %16, %20 : f32
    %c0_8 = arith.constant 0 : index
    %c0_9 = arith.constant 0 : index
    %22 = memref.load %arg3[%c0_8, %c0_9] : memref<1x1xf32, #tpu.memory_space<smem>>
    memref.store %21, %arg3[%c0_8, %c0_9] : memref<1x1xf32, #tpu.memory_space<smem>>
    return
  }
  func.func @transform_0(%arg0: i32) -> (i32, i32) {
    %c0_i32 = arith.constant 0 : i32
    %c0_i32_0 = arith.constant 0 : i32
    return %arg0, %c0_i32 : i32, i32
  }
  func.func @transform_1(%arg0: i32) -> (i32, i32) {
    %c0_i32 = arith.constant 0 : i32
    %c0_i32_0 = arith.constant 0 : i32
    return %arg0, %c0_i32 : i32, i32
  }
  func.func @transform_2(%arg0: i32) -> (i32, i32) {
    %c0_i32 = arith.constant 0 : i32
    %c0_i32_0 = arith.constant 0 : i32
    %c0_i32_1 = arith.constant 0 : i32
    return %c0_i32, %c0_i32_0 : i32, i32
  }
}

</mosaic_0001>

<bundles_post_ra>
// kernel: tpu_custom_call.1
= control target key start
LH: loop header
LB: loop body
LE: loop exit
PB: predicated region body
PF: predicated region fallthrough
CT: control target
= control target key end

     0   :  { %7 = vsyncpa [#allocation3], 0  ;;  %s212_s0 = inlined_call_operand.hbm [shape: f32[8,512], index: 0, kind: input, shape index: {}]   ;;  %s213_s1 = inlined_call_operand.hbm [shape: f32[8,512], index: 1, kind: input, shape index: {}]   ;;  %s214_s2 = inlined_call_operand.hbm [shape: f32[1,1], index: 2, kind: output, shape index: {}]  }
   0x1   :  { %8 = vsyncpa [#allocation6], 0 }
   0x2   :  { %9 = vsyncpa [#allocation4], 0  ;;  %s182_s9 = smov [#allocation2]   ;;  %s183_s11 = smov [#allocation5]  }
   0x3   :  { %s16_s10 = sshll.u32 %s182_s9, 4  ;;  %s26_s12 = sshll.u32 %s183_s11, 4  ;;  %s17_s10 = int_to_ptr.vmem [resolvable:$true] %s16_s10  ;;  %s27_s12 = int_to_ptr.vmem [resolvable:$true] %s26_s12 }
   0x4   :  { %s136_s13 = scalar_lea.vmem %s17_s10, 512  ;;  %p141_p1 = scmp.lt.s32.totalorder %s17_s10, %s17_s10 }
   0x5   :  { %p137_p0 = scmp.ne.s32.totalorder %s17_s10, %s136_s13  ;;  %p142_p2 = scmp.lt.s32.totalorder %s136_s13, %s136_s13 }
   0x7   :  { %p143_p3 = por %p142_p2, %p141_p1 }
   0x9   :  { %p144_p4 = pnand %p143_p3, %p137_p0 }
   0xb   :  { %147 = shalt.err (!%p144_p4)
}
   0xc   :  { %19 = dma.hbm_to_vmem [thread:$0]  %s212_s0, 512, %s17_s10, [#allocation3]  }
   0xd   :  { %s156_s16 = scalar_lea.vmem %s27_s12, 512  ;;  %p161_p6 = scmp.lt.s32.totalorder %s27_s12, %s27_s12 }
   0xe   :  { %p157_p5 = scmp.ne.s32.totalorder %s27_s12, %s156_s16  ;;  %p162_p7 = scmp.lt.s32.totalorder %s156_s16, %s156_s16 }
  0x10   :  { %p163_p8 = por %p162_p7, %p161_p6 }
  0x12   :  { %p164_p9 = pnand %p163_p8, %p157_p5 }
  0x14   :  { %167 = shalt.err (!%p164_p9)
}
  0x15   :  { %29 = dma.hbm_to_vmem [thread:$0]  %s213_s1, 512, %s27_s12, [#allocation6]  }
  0x16   :  { %176 = dma.done.wait [#allocation3], 512  }
  0x17   :  { %177 = vsyncadd [#allocation3], 4294966784 }
  0x18   :  { %178 = dma.done.wait [#allocation6], 512  }
  0x19   :  { %179 = vsyncadd [#allocation6], 4294966784  ;;  %v42_v0 = vld [vmem:[#allocation2] sm:$0xff]  ;;  %v43_v1 = vld [vmem:[#allocation2 + $0x8] sm:$0xff]  ;;  %v184_v12 = vmov 0.0   ;;  %s185_s1 = smov [#allocation7]  }
  0x1a   :  { %v44_v2 = vld [vmem:[#allocation2 + $0x10] sm:$0xff]  ;;  %v45_v3 = vld [vmem:[#allocation2 + $0x18] sm:$0xff]  ;;  %v46_v4 = vld [vmem:[#allocation5] sm:$0xff]  ;;  %vm54_vm0 = vcmp.gt.f32.partialorder %v42_v0, 0.0  ;;  %vm55_vm1 = vcmp.gt.f32.partialorder %v43_v1, 0.0 }
  0x1b   :  { %v47_v5 = vld [vmem:[#allocation5 + $0x8] sm:$0xff]  ;;  %vm56_vm2 = vcmp.gt.f32.partialorder %v44_v2, 0.0  ;;  %v48_v6 = vld [vmem:[#allocation5 + $0x10] sm:$0xff]  ;;  %v49_v7 = vld [vmem:[#allocation5 + $0x18] sm:$0xff]  ;;  %v50_v8 = vsub.f32 %v42_v0, %v46_v4  ;;  %vm57_vm3 = vcmp.gt.f32.partialorder %v45_v3, 0.0  ;;  %vm58_vm4 = vcmp.gt.f32.partialorder %v46_v4, 0.0 }
  0x1c   :  { %v51_v9 = vsub.f32 %v43_v1, %v47_v5  ;;  %v52_v10 = vsub.f32 %v44_v2, %v48_v6  ;;  %v53_v11 = vsub.f32 %v45_v3, %v49_v7  ;;  %vm59_vm5 = vcmp.gt.f32.partialorder %v47_v5, 0.0  ;;  %vm62_vm7 = vmor %vm54_vm0, %vm58_vm4 }
  0x1d   :  { %vm60_vm6 = vcmp.gt.f32.partialorder %v48_v6, 0.0  ;;  %vm61_vm8 = vcmp.gt.f32.partialorder %v49_v7, 0.0  ;;  %vm63_vm9 = vmor %vm55_vm1, %vm59_vm5  ;;  %v117_v13 = vsel %vm62_vm7, 1.0, %v184_v12  ;;  %v74_v14 = vmul.f32 %v50_v8, %v50_v8 }
  0x1e   :  { %v75_v15 = vmul.f32 %v51_v9, %v51_v9  ;;  %vm64_vm10 = vmor %vm56_vm2, %vm60_vm6  ;;  %v118_v16 = vsel %vm63_vm9, 1.0, %v184_v12  ;;  %v76_v17 = vmul.f32 %v52_v10, %v52_v10  ;;  %v77_v18 = vmul.f32 %v53_v11, %v53_v11 }
  0x1f   :  { %vm65_vm11 = vmor %vm57_vm3, %vm61_vm8  ;;  %v119_v19 = vsel %vm64_vm10, 1.0, %v184_v12  ;;  %v78_v20 = vmul.f32 %v117_v13, %v74_v14 }
  0x20   :  { %v79_v21 = vmul.f32 %v118_v16, %v75_v15  ;;  %v120_v22 = vsel %vm65_vm11, 1.0, %v184_v12  ;;  %v80_v23 = vmul.f32 %v119_v19, %v76_v17 }
  0x21   :  { %v81_v24 = vmul.f32 %v120_v22, %v77_v18  ;;  %v82_v25 = vand.u32 2147483647, %v78_v20 }
  0x22   :  { %v83_v26 = vand.u32 2147483647, %v79_v21  ;;  %v84_v27 = vand.u32 2147483647, %v80_v23 }
  0x23   :  { %v85_v28 = vand.u32 2147483647, %v81_v24 }
  0x24   :  { %v87_v29 = vadd.f32 %v83_v26, %v82_v25 }
  0x26   :  { %v88_v30 = vadd.f32 %v87_v29, %v84_v27 }
  0x28   :  { %v89_v31 = vadd.f32 %v88_v30, %v85_v28 }
  0x2a   :  { %90 = vadd.xlane.f32.xlu0 %v89_v31 }
  0xb3   :  { %v91_v32 = vpop.xlane.xlu0 %90 }
  0xb4   :  { %v92_v33 = vrot.slane %v91_v32, 4 }
  0xb6   :  { %v93_v34 = vadd.f32 %v92_v33, %v91_v32 }
  0xb8   :  { %v94_v35 = vrot.slane %v93_v34, 2 }
  0xba   :  { %v95_v36 = vadd.f32 %v94_v35, %v93_v34 }
  0xbc   :  { %v96_v37 = vrot.slane %v95_v36, 1 }
  0xbe   :  { %v97_v38 = vadd.f32 %v96_v37, %v95_v36 }
  0xc0   :  { %121 = vpush %v97_v38 }
  0xf1   :  { %s122_s0 = spop %121 }
  0xf2   :  { %101 = sst [smem:[#allocation7]] %s122_s0 }
  0xf3   :  { %109 = dma.smem_to_hbm %s185_s1, 16, %s214_s2, [#allocation4]  }
  0xf4   :  { %180 = dma.done.wait [#allocation4], 16  }
  0xf5   :  { %181 = vsyncadd [#allocation4], 4294967280 }
  0xf6   :  { %113 = sfence }
  0xf7   :  { %114 = vsyncpa [#allocation3], 1 }
  0xf8   :  { %115 = vsyncpa [#allocation6], 1 }
  0xf9   :  { %116 = vsyncpa [#allocation4], 1 }

</bundles_post_ra>
